<compile_context>
chip_gen: v7x
topology: tpu7x:2x2x1
jax: 0.10.0
libtpu: 0.0.40
codegen_flags: <defaults>
</compile_context>

<pallas_src>
import numpy as np
import jax
import jax.numpy as jnp
from jax.experimental import pallas as pl
from jax.experimental.pallas import tpu as pltpu

NEG = float(np.finfo(np.float32).min)  # finite stand-in for -inf pool padding


def _hidden_dims(cfg):
    hd = cfg["hidden_dims"]
    if not hasattr(hd, "__iter__"):
        hd = [hd]
    return list(hd)


def _pool_dims(L, k):
    p = k // 2
    Lp = (L + 2 * p - k) // k + 1        # MaxPool1d output length
    P = Lp * k                            # padded frame covering all windows
    M_len = P - k + 1                     # sliding-max length
    return p, Lp, P, M_len


def _interp_matrix(n_in, n_out):
    """F.interpolate(mode='linear', align_corners=False) as an (n_in, n_out)
    matrix: out = theta @ M."""
    scale = n_in / n_out
    j = np.arange(n_out)
    src = (j + 0.5) * scale - 0.5
    src = np.maximum(src, 0.0)
    i0 = np.minimum(np.floor(src).astype(np.int64), n_in - 1)
    i1 = np.minimum(i0 + 1, n_in - 1)
    w1 = (src - i0).astype(np.float32)
    w0 = (1.0 - w1).astype(np.float32)
    m = np.zeros((n_in, n_out), dtype=np.float32)
    m[i0, j] += w0
    m[i1, j] += w1
    return m


def init_params(cfg, key):
    """Raw (un-folded) parameters mirroring the PyTorch module in eval mode."""
    L = cfg["input_len"] * cfg["input_dim"]
    out_multi = cfg["output_len"] * cfg["output_dim"]
    k = cfg["pool_kernel_dim"]
    T = cfg["stack_num"] * cfg["block_num_per_stack"]
    p, Lp, P, M_len = _pool_dims(L, k)
    mlp_in = int(np.ceil(L / k + 1))
    assert mlp_in == Lp, "pick L divisible by an even pool kernel so MLP dims match pooling"
    dims = [mlp_in] + _hidden_dims(cfg)
    nb = int(max(L // cfg["downsample_factor"], 1))
    nf = int(max(out_multi // cfg["downsample_factor"], 1))
    eps = 1e-5

    params = {"layer_dims": dims}
    n_layers = len(dims) - 1
    keys = jax.random.split(key, 6 * n_layers + 4)
    ki = 0
    for i in range(1, len(dims)):
        d_in, d_out = dims[i - 1], dims[i]
        params[f"W{i-1}"] = 0.1 * jax.random.normal(keys[ki], (T, d_in, d_out), jnp.float32); ki += 1
        params[f"b{i-1}"] = 0.05 * jax.random.normal(keys[ki], (T, 1, d_out), jnp.float32); ki += 1
        # BatchNorm1d eval mode (randomized stats/affine to exercise the fold)
        gamma = 1.0 + 0.1 * jax.random.normal(keys[ki], (T, 1, d_out), jnp.float32); ki += 1
        beta = 0.1 * jax.random.normal(keys[ki], (T, 1, d_out), jnp.float32); ki += 1
        rmean = 0.1 * jax.random.normal(keys[ki], (T, 1, d_out), jnp.float32); ki += 1
        rvar = jax.random.uniform(keys[ki], (T, 1, d_out), jnp.float32, minval=0.5, maxval=1.5); ki += 1
        scale = gamma / jnp.sqrt(rvar + eps)
        params[f"scale{i-1}"] = scale
        params[f"shift{i-1}"] = beta - rmean * scale
    d_last = dims[-1]
    params["Wb"] = 0.1 * jax.random.normal(keys[ki], (T, d_last, nb), jnp.float32); ki += 1
    params["bb"] = 0.05 * jax.random.normal(keys[ki], (T, 1, nb), jnp.float32); ki += 1
    params["Wf"] = 0.1 * jax.random.normal(keys[ki], (T, d_last, nf), jnp.float32); ki += 1
    params["bf"] = 0.05 * jax.random.normal(keys[ki], (T, 1, nf), jnp.float32); ki += 1
    params["Ib"] = jnp.asarray(_interp_matrix(nb, L))
    params["If"] = jnp.asarray(_interp_matrix(nf, out_multi))
    return params


def fold_params(params, cfg):
    """Exact offline folds: pool-selection -> W0, BN scale/shift -> next linear,
    interpolation matrices -> projections, and backcast/forecast fused into a
    single (sign-folded) tail projection: state += h @ Wbf + bbf."""
    L = cfg["input_len"] * cfg["input_dim"]
    k = cfg["pool_kernel_dim"]
    p, Lp, P, M_len = _pool_dims(L, k)
    dims = params["layer_dims"]
    n_layers = len(dims) - 1

    # pooled = sliding_max @ S, with S[j*k, j] = 1
    S = np.zeros((M_len, Lp), np.float32)
    S[np.arange(Lp) * k, np.arange(Lp)] = 1.0
    S = jnp.asarray(S)

    folded = {}
    folded["W0"] = jnp.einsum("ml,tld->tmd", S, params["W0"])         # (T, M_len, d0)
    folded["b0"] = params["b0"]
    for i in range(1, n_layers):
        sc = params[f"scale{i-1}"]                                    # (T,1,d_prev)
        sh = params[f"shift{i-1}"]
        W = params[f"W{i}"]                                           # (T,d_prev,d_i)
        b = params[f"b{i}"]
        folded[f"W{i}"] = jnp.swapaxes(sc, 1, 2) * W
        folded[f"b{i}"] = b + jnp.einsum("tod,tde->toe", sh, W)

    sc = params[f"scale{n_layers-1}"]
    sh = params[f"shift{n_layers-1}"]
    Ib, If = params["Ib"], params["If"]
    Wb_bn = jnp.swapaxes(sc, 1, 2) * params["Wb"]
    bb_bn = params["bb"] + jnp.einsum("tod,tde->toe", sh, params["Wb"])
    Wf_bn = jnp.swapaxes(sc, 1, 2) * params["Wf"]
    bf_bn = params["bf"] + jnp.einsum("tod,tde->toe", sh, params["Wf"])
    Wb_full = jnp.einsum("tdn,nl->tdl", Wb_bn, Ib)                    # (T, d_last, L)
    bb_full = jnp.einsum("ton,nl->tol", bb_bn, Ib)                    # (T, 1, L)
    Wf_full = jnp.einsum("tdn,nl->tdl", Wf_bn, If)                    # (T, d_last, out_multi)
    bf_full = jnp.einsum("ton,nl->tol", bf_bn, If)                    # (T, 1, out_multi)
    # Fused tail: state(+residual||forecast) += h @ Wbf + bbf, with the minus
    # sign of the backcast update folded into the weights/bias.
    folded["Wbf"] = jnp.concatenate([-Wb_full, Wf_full], axis=-1)     # (T, d_last, L+out_multi)
    folded["bbf"] = jnp.concatenate([-bb_full, bf_full], axis=-1)     # (T, 1, L+out_multi)
    return folded


def _make_kernel(n_layers, T, L, out_multi, k, matmul_dtype=jnp.float32):
    p, Lp, P, M_len = _pool_dims(L, k)
    take = min(L, P - p)
    back = P - p - take

    def mm(a, w):
        # weights are pre-cast to matmul_dtype on the host; only cast the
        # activation here (f32 accumulate either way).
        if matmul_dtype != jnp.float32:
            a = a.astype(matmul_dtype)
        return jnp.dot(a, w, preferred_element_type=jnp.float32)

    def kernel(*refs):
        # refs: x, [W_i, b_i]*n_layers, Wbf, bbf, out_ref, frame_scratch
        x_ref = refs[0]
        idx = 1
        Ws, bs = [], []
        for _ in range(n_layers):
            Ws.append(refs[idx]); bs.append(refs[idx + 1]); idx += 2
        wbf_ref, bbf_ref = refs[idx], refs[idx + 1]
        out_ref = refs[idx + 2]
        frame_ref = refs[idx + 3]

        Bt = x_ref.shape[0]

        # --- persistent NEG padding of the pool frame --------------------
        # Written once per grid step (NOT guarded by program_id: each core on
        # a megacore chip owns its own scratch and must initialize it).
        if p > 0:
            frame_ref[:, 0:p] = jnp.full((Bt, p), NEG, jnp.float32)
        if back > 0:
            frame_ref[:, p + take:P] = jnp.full((Bt, back), NEG, jnp.float32)

        # state = [ residual (L lanes) | forecast accumulator (out_multi lanes) ]
        state = jnp.concatenate(
            [x_ref[...], jnp.zeros((Bt, out_multi), jnp.float32)], axis=-1)

        for t in range(T):
            # --- MaxPool1d(kernel=k, stride=k, padding=k//2) -------------
            # Store the current residual into the frame interior (padding is
            # already NEG), then take k shifted lane slices and elementwise
            # maxima; the per-window pick is folded into W0.
            frame_ref[:, p:p + take] = state[:, :take]
            m = frame_ref[:, 0:M_len]
            for s in range(1, k):
                m = jnp.maximum(m, frame_ref[:, s:s + M_len])     # (Bt, M_len)

            # --- leading MLP: Linear -> ReLU (BN/dropout folded) ---------
            h = m
            for i in range(n_layers):
                h = mm(h, Ws[i][t]) + bs[i][t]
                h = jnp.maximum(h, 0.0)

            # --- fused (-backcast || forecast) tail, accumulated in place
            state = state + (mm(h, wbf_ref[t]) + bbf_ref[t])

        out_ref[...] = state                                       # (Bt, L+out_multi)

    return kernel


def _batch_tiling(B):
    """Pick (B_pad, B_tile). Guarantees >= 2 grid steps whenever B > 8 so the
    second TensorCore on v7x gets work; tiles grow up to 512 rows to amortize
    MXU weight-load/drain latency and per-step pipeline overhead."""
    def rup(x, m):
        return int(-(-x // m) * m)
    if B <= 8:
        B_tile = rup(B, 8)
        B_pad = B_tile
    elif B <= 1024:
        B_tile = rup(-(-B // 2), 8)          # ceil(B/2), sublane multiple
        B_pad = 2 * B_tile
    else:
        B_tile = 512
        B_pad = rup(B, B_tile)
    return B_pad, B_tile


def nhits_forward(x, folded, cfg, matmul_dtype=jnp.float32):
    B, L = x.shape
    out_multi = cfg["output_len"] * cfg["output_dim"]
    k = cfg["pool_kernel_dim"]
    T = cfg["stack_num"] * cfg["block_num_per_stack"]
    hidden = _hidden_dims(cfg)
    n_layers = len(hidden)
    p, Lp, P, M_len = _pool_dims(L, k)

    B_pad, B_tile = _batch_tiling(B)
    if B_pad != B:
        x = jnp.concatenate([x, jnp.zeros((B_pad - B, L), x.dtype)], axis=0)
    grid = (B_pad // B_tile,)

    inputs = [x]
    in_specs = [pl.BlockSpec((B_tile, L), lambda b: (b, 0))]
    weight_names = []
    for i in range(n_layers):
        weight_names += [f"W{i}", f"b{i}"]
    weight_names += ["Wbf", "bbf"]
    for name in weight_names:
        arr = folded[name]
        # Host-side cast of matmul operands (weights); biases stay f32.
        if name.startswith("W") and matmul_dtype != jnp.float32:
            arr = arr.astype(matmul_dtype)
        inputs.append(arr)
        # full-array block: parameters stay VMEM-resident, no per-step re-DMA
        in_specs.append(pl.BlockSpec(arr.shape, lambda b: (0, 0, 0)))

    kernel = _make_kernel(n_layers, T, L, out_multi, k, matmul_dtype=matmul_dtype)

    # Advisory cost estimate for XLA's scheduler.
    dims = [Lp] + hidden
    flops_per_row_t = sum(2 * dims[i] * dims[i + 1] for i in range(n_layers))
    flops_per_row_t += 2 * dims[-1] * (L + out_multi)
    flops = int(B_pad) * int(T) * int(flops_per_row_t)
    bytes_accessed = int(x.size) * 4 + int(B_pad) * (L + out_multi) * 4
    for a in inputs[1:]:
        bytes_accessed += int(np.prod(a.shape)) * int(jnp.dtype(a.dtype).itemsize)
    cost = pl.CostEstimate(flops=flops, transcendentals=0,
                           bytes_accessed=int(bytes_accessed))

    out = pl.pallas_call(
        kernel,
        out_shape=jax.ShapeDtypeStruct((B_pad, L + out_multi), jnp.float32),
        grid_spec=pltpu.PrefetchScalarGridSpec(
            num_scalar_prefetch=0,
            grid=grid,
            in_specs=in_specs,
            out_specs=pl.BlockSpec((B_tile, L + out_multi), lambda b: (b, 0)),
            scratch_shapes=[pltpu.VMEM((B_tile, P), jnp.float32)]),
        compiler_params=pltpu.CompilerParams(
            dimension_semantics=("parallel",)),
        cost_estimate=cost,
    )(*inputs)

    resid = out[:B, :L]
    forecast = out[:B, L:].reshape(B, cfg["output_len"], cfg["output_dim"])
    return resid, forecast


def reference_forward(x, params, cfg):
    """Pure-JAX reference mirroring the PyTorch forward (eval mode), using the
    raw (un-folded) parameters."""
    B, L = x.shape
    k = cfg["pool_kernel_dim"]
    p = k // 2
    Lp = (L + 2 * p - k) // k + 1
    out_multi = cfg["output_len"] * cfg["output_dim"]
    T = cfg["stack_num"] * cfg["block_num_per_stack"]
    n_layers = len(params["layer_dims"]) - 1
    residual = x
    forecast = jnp.zeros((B, out_multi), jnp.float32)
    for t in range(T):
        r = residual
        windows = []
        for j in range(Lp):
            lo = max(0, j * k - p)
            hi = min(L, j * k - p + k)
            windows.append(jnp.max(r[:, lo:hi], axis=-1, keepdims=True))
        h = jnp.concatenate(windows, axis=-1)
        for i in range(n_layers):
            h = h @ params[f"W{i}"][t] + params[f"b{i}"][t]
            h = jnp.maximum(h, 0.0)
            h = h * params[f"scale{i}"][t] + params[f"shift{i}"][t]
        tb = h @ params["Wb"][t] + params["bb"][t]
        tf = h @ params["Wf"][t] + params["bf"][t]
        residual = r - tb @ params["Ib"]
        forecast = forecast + tf @ params["If"]
    return residual, forecast.reshape(B, cfg["output_len"], cfg["output_dim"])


if __name__ == "__main__":
    cfg = dict(
        input_len=16, output_len=8, input_dim=2, output_dim=2,
        stack_num=2, block_num_per_stack=2,
        hidden_dims=[32, 32],        # block_leadingMLP_hidden_dims
        pool_kernel_dim=4,           # MaxPool1d kernel/stride, padding=k//2
        downsample_factor=4,
    )
    key = jax.random.PRNGKey(0)
    kp, kx = jax.random.split(key)
    params = init_params(cfg, kp)
    folded = fold_params(params, cfg)

    B = 8
    L = cfg["input_len"] * cfg["input_dim"]            # input_len_multi = 32
    x = jax.random.normal(kx, (B, L), jnp.float32)

    # Default matmul_dtype=f32 for exactness; pass jnp.bfloat16 on v6e/v7x for
    # higher MXU throughput (accumulation stays f32, elementwise stays f32) —
    # loosen the tolerance below if you do.
    resid, forecast = nhits_forward(x, folded, cfg)
    jax.block_until_ready((resid, forecast))

    resid_ref, forecast_ref = reference_forward(x, params, cfg)
    np.testing.assert_allclose(np.asarray(resid), np.asarray(resid_ref),
                               rtol=2e-3, atol=2e-3)
    np.testing.assert_allclose(np.asarray(forecast), np.asarray(forecast_ref),
                               rtol=2e-3, atol=2e-3)
    print("KERNEL_OK")
</pallas_src>

<mosaic_0001>
module attributes {stable_mosaic.version = 11 : i64} {
  func.func @kernel(%arg0: i32, %arg1: memref<8x32xf32, #tpu.memory_space<vmem>>, %arg2: memref<4x33x32xf32, #tpu.memory_space<vmem>>, %arg3: memref<4x1x32xf32, #tpu.memory_space<vmem>>, %arg4: memref<4x32x32xf32, #tpu.memory_space<vmem>>, %arg5: memref<4x1x32xf32, #tpu.memory_space<vmem>>, %arg6: memref<4x32x48xf32, #tpu.memory_space<vmem>>, %arg7: memref<4x1x48xf32, #tpu.memory_space<vmem>>, %arg8: memref<8x48xf32, #tpu.memory_space<vmem>>, %arg9: memref<8x36xf32, #tpu.memory_space<vmem>>) attributes {dimension_semantics = [#tpu.dimension_semantics<parallel>], iteration_bounds = array<i64: 1>, scalar_prefetch = 0 : i64, scratch_operands = 1 : i64, tpu.core_type = #tpu.core_type<tc>, window_params = [{transform_indices = @transform_0, window_bounds = array<i64: 8, 32>}, {pipeline_mode = #tpu.pipeline_mode<synchronous>, transform_indices = @transform_1, window_bounds = array<i64: 4, 33, 32>}, {pipeline_mode = #tpu.pipeline_mode<synchronous>, transform_indices = @transform_2, window_bounds = array<i64: 4, 1, 32>}, {pipeline_mode = #tpu.pipeline_mode<synchronous>, transform_indices = @transform_3, window_bounds = array<i64: 4, 32, 32>}, {pipeline_mode = #tpu.pipeline_mode<synchronous>, transform_indices = @transform_4, window_bounds = array<i64: 4, 1, 32>}, {pipeline_mode = #tpu.pipeline_mode<synchronous>, transform_indices = @transform_5, window_bounds = array<i64: 4, 32, 48>}, {pipeline_mode = #tpu.pipeline_mode<synchronous>, transform_indices = @transform_6, window_bounds = array<i64: 4, 1, 48>}, {transform_indices = @transform_7, window_bounds = array<i64: 8, 48>}]} {
    %cst = arith.constant -3.40282347E+38 : f32
    %0 = vector.broadcast %cst : f32 to vector<8x2xf32>
    %c0 = arith.constant 0 : index
    %c0_0 = arith.constant 0 : index
    %1 = vector.load %arg9[%c0, %c0_0] : memref<8x36xf32, #tpu.memory_space<vmem>>, vector<8x2xf32>
    tpu.vector_store %arg9[%c0, %c0_0], %0 {strides = array<i32>} : memref<8x36xf32, #tpu.memory_space<vmem>>, vector<8x2xf32>,
    %cst_1 = arith.constant -3.40282347E+38 : f32
    %2 = vector.broadcast %cst_1 : f32 to vector<8x2xf32>
    %c0_2 = arith.constant 0 : index
    %c34 = arith.constant 34 : index
    %3 = vector.load %arg9[%c0_2, %c34] : memref<8x36xf32, #tpu.memory_space<vmem>>, vector<8x2xf32>
    tpu.vector_store %arg9[%c0_2, %c34], %2 {strides = array<i32>} : memref<8x36xf32, #tpu.memory_space<vmem>>, vector<8x2xf32>,
    %c0_3 = arith.constant 0 : index
    %c0_4 = arith.constant 0 : index
    %4 = vector.load %arg1[%c0_3, %c0_4] : memref<8x32xf32, #tpu.memory_space<vmem>>, vector<8x32xf32>
    %cst_5 = arith.constant 0.000000e+00 : f32
    %5 = vector.broadcast %cst_5 : f32 to vector<8x16xf32>
    %6 = tpu.concatenate %4, %5 in 1 : vector<8x32xf32>, vector<8x16xf32> -> vector<8x48xf32>
    %7 = vector.extract_strided_slice %6 {offsets = [0, 0], sizes = [8, 32], strides = [1, 1]} : vector<8x48xf32> to vector<8x32xf32>
    %c0_6 = arith.constant 0 : index
    %c2 = arith.constant 2 : index
    %8 = vector.load %arg9[%c0_6, %c2] : memref<8x36xf32, #tpu.memory_space<vmem>>, vector<8x32xf32>
    tpu.vector_store %arg9[%c0_6, %c2], %7 {strides = array<i32>} : memref<8x36xf32, #tpu.memory_space<vmem>>, vector<8x32xf32>,
    %c0_7 = arith.constant 0 : index
    %c0_8 = arith.constant 0 : index
    %9 = vector.load %arg9[%c0_7, %c0_8] : memref<8x36xf32, #tpu.memory_space<vmem>>, vector<8x33xf32>
    %c0_9 = arith.constant 0 : index
    %c1 = arith.constant 1 : index
    %10 = vector.load %arg9[%c0_9, %c1] : memref<8x36xf32, #tpu.memory_space<vmem>>, vector<8x33xf32>
    %11 = arith.maximumf %9, %10 : vector<8x33xf32>
    %c0_10 = arith.constant 0 : index
    %c2_11 = arith.constant 2 : index
    %12 = vector.load %arg9[%c0_10, %c2_11] : memref<8x36xf32, #tpu.memory_space<vmem>>, vector<8x33xf32>
    %13 = arith.maximumf %11, %12 : vector<8x33xf32>
    %c0_12 = arith.constant 0 : index
    %c3 = arith.constant 3 : index
    %14 = vector.load %arg9[%c0_12, %c3] : memref<8x36xf32, #tpu.memory_space<vmem>>, vector<8x33xf32>
    %15 = arith.maximumf %13, %14 : vector<8x33xf32>
    %c0_13 = arith.constant 0 : index
    %c0_14 = arith.constant 0 : index
    %c0_15 = arith.constant 0 : index
    %16 = vector.load %arg2[%c0_13, %c0_14, %c0_15] : memref<4x33x32xf32, #tpu.memory_space<vmem>>, vector<1x33x32xf32>
    %17 = vector.shape_cast %16 : vector<1x33x32xf32> to vector<33x32xf32>
    %cst_16 = arith.constant dense<0.000000e+00> : vector<8x32xf32>
    %18 = tpu.matmul %15, %17, %cst_16 {dimension_numbers = #tpu.dot_dimension_numbers<[1], [0], [0], [1], [0, 0, 1, 1], [], []>} : vector<8x33xf32>, vector<33x32xf32>, vector<8x32xf32> -> vector<8x32xf32>
    %c0_17 = arith.constant 0 : index
    %c0_18 = arith.constant 0 : index
    %c0_19 = arith.constant 0 : index
    %19 = vector.load %arg3[%c0_17, %c0_18, %c0_19] : memref<4x1x32xf32, #tpu.memory_space<vmem>>, vector<1x1x32xf32>
    %20 = vector.shape_cast %19 : vector<1x1x32xf32> to vector<1x32xf32>
    %21 = vector.broadcast %20 : vector<1x32xf32> to vector<8x32xf32>
    %22 = arith.addf %18, %21 : vector<8x32xf32>
    %cst_20 = arith.constant 0.000000e+00 : f32
    %23 = vector.broadcast %cst_20 : f32 to vector<8x32xf32>
    %24 = arith.maximumf %22, %23 : vector<8x32xf32>
    %c0_21 = arith.constant 0 : index
    %c0_22 = arith.constant 0 : index
    %c0_23 = arith.constant 0 : index
    %25 = vector.load %arg4[%c0_21, %c0_22, %c0_23] : memref<4x32x32xf32, #tpu.memory_space<vmem>>, vector<1x32x32xf32>
    %26 = vector.shape_cast %25 : vector<1x32x32xf32> to vector<32x32xf32>
    %cst_24 = arith.constant dense<0.000000e+00> : vector<8x32xf32>
    %27 = tpu.matmul %24, %26, %cst_24 {dimension_numbers = #tpu.dot_dimension_numbers<[1], [0], [0], [1], [0, 0, 1, 1], [], []>} : vector<8x32xf32>, vector<32x32xf32>, vector<8x32xf32> -> vector<8x32xf32>
    %c0_25 = arith.constant 0 : index
    %c0_26 = arith.constant 0 : index
    %c0_27 = arith.constant 0 : index
    %28 = vector.load %arg5[%c0_25, %c0_26, %c0_27] : memref<4x1x32xf32, #tpu.memory_space<vmem>>, vector<1x1x32xf32>
    %29 = vector.shape_cast %28 : vector<1x1x32xf32> to vector<1x32xf32>
    %30 = vector.broadcast %29 : vector<1x32xf32> to vector<8x32xf32>
    %31 = arith.addf %27, %30 : vector<8x32xf32>
    %cst_28 = arith.constant 0.000000e+00 : f32
    %32 = vector.broadcast %cst_28 : f32 to vector<8x32xf32>
    %33 = arith.maximumf %31, %32 : vector<8x32xf32>
    %c0_29 = arith.constant 0 : index
    %c0_30 = arith.constant 0 : index
    %c0_31 = arith.constant 0 : index
    %34 = vector.load %arg6[%c0_29, %c0_30, %c0_31] : memref<4x32x48xf32, #tpu.memory_space<vmem>>, vector<1x32x48xf32>
    %35 = vector.shape_cast %34 : vector<1x32x48xf32> to vector<32x48xf32>
    %cst_32 = arith.constant dense<0.000000e+00> : vector<8x48xf32>
    %36 = tpu.matmul %33, %35, %cst_32 {dimension_numbers = #tpu.dot_dimension_numbers<[1], [0], [0], [1], [0, 0, 1, 1], [], []>} : vector<8x32xf32>, vector<32x48xf32>, vector<8x48xf32> -> vector<8x48xf32>
    %c0_33 = arith.constant 0 : index
    %c0_34 = arith.constant 0 : index
    %c0_35 = arith.constant 0 : index
    %37 = vector.load %arg7[%c0_33, %c0_34, %c0_35] : memref<4x1x48xf32, #tpu.memory_space<vmem>>, vector<1x1x48xf32>
    %38 = vector.shape_cast %37 : vector<1x1x48xf32> to vector<1x48xf32>
    %39 = vector.broadcast %38 : vector<1x48xf32> to vector<8x48xf32>
    %40 = arith.addf %36, %39 : vector<8x48xf32>
    %41 = arith.addf %6, %40 : vector<8x48xf32>
    %42 = vector.extract_strided_slice %41 {offsets = [0, 0], sizes = [8, 32], strides = [1, 1]} : vector<8x48xf32> to vector<8x32xf32>
    %c0_36 = arith.constant 0 : index
    %c2_37 = arith.constant 2 : index
    %43 = vector.load %arg9[%c0_36, %c2_37] : memref<8x36xf32, #tpu.memory_space<vmem>>, vector<8x32xf32>
    tpu.vector_store %arg9[%c0_36, %c2_37], %42 {strides = array<i32>} : memref<8x36xf32, #tpu.memory_space<vmem>>, vector<8x32xf32>,
    %c0_38 = arith.constant 0 : index
    %c0_39 = arith.constant 0 : index
    %44 = vector.load %arg9[%c0_38, %c0_39] : memref<8x36xf32, #tpu.memory_space<vmem>>, vector<8x33xf32>
    %c0_40 = arith.constant 0 : index
    %c1_41 = arith.constant 1 : index
    %45 = vector.load %arg9[%c0_40, %c1_41] : memref<8x36xf32, #tpu.memory_space<vmem>>, vector<8x33xf32>
    %46 = arith.maximumf %44, %45 : vector<8x33xf32>
    %c0_42 = arith.constant 0 : index
    %c2_43 = arith.constant 2 : index
    %47 = vector.load %arg9[%c0_42, %c2_43] : memref<8x36xf32, #tpu.memory_space<vmem>>, vector<8x33xf32>
    %48 = arith.maximumf %46, %47 : vector<8x33xf32>
    %c0_44 = arith.constant 0 : index
    %c3_45 = arith.constant 3 : index
    %49 = vector.load %arg9[%c0_44, %c3_45] : memref<8x36xf32, #tpu.memory_space<vmem>>, vector<8x33xf32>
    %50 = arith.maximumf %48, %49 : vector<8x33xf32>
    %c1_46 = arith.constant 1 : index
    %c0_47 = arith.constant 0 : index
    %c0_48 = arith.constant 0 : index
    %51 = vector.load %arg2[%c1_46, %c0_47, %c0_48] : memref<4x33x32xf32, #tpu.memory_space<vmem>>, vector<1x33x32xf32>
    %52 = vector.shape_cast %51 : vector<1x33x32xf32> to vector<33x32xf32>
    %cst_49 = arith.constant dense<0.000000e+00> : vector<8x32xf32>
    %53 = tpu.matmul %50, %52, %cst_49 {dimension_numbers = #tpu.dot_dimension_numbers<[1], [0], [0], [1], [0, 0, 1, 1], [], []>} : vector<8x33xf32>, vector<33x32xf32>, vector<8x32xf32> -> vector<8x32xf32>
    %c1_50 = arith.constant 1 : index
    %c0_51 = arith.constant 0 : index
    %c0_52 = arith.constant 0 : index
    %54 = vector.load %arg3[%c1_50, %c0_51, %c0_52] : memref<4x1x32xf32, #tpu.memory_space<vmem>>, vector<1x1x32xf32>
    %55 = vector.shape_cast %54 : vector<1x1x32xf32> to vector<1x32xf32>
    %56 = vector.broadcast %55 : vector<1x32xf32> to vector<8x32xf32>
    %57 = arith.addf %53, %56 : vector<8x32xf32>
    %cst_53 = arith.constant 0.000000e+00 : f32
    %58 = vector.broadcast %cst_53 : f32 to vector<8x32xf32>
    %59 = arith.maximumf %57, %58 : vector<8x32xf32>
    %c1_54 = arith.constant 1 : index
    %c0_55 = arith.constant 0 : index
    %c0_56 = arith.constant 0 : index
    %60 = vector.load %arg4[%c1_54, %c0_55, %c0_56] : memref<4x32x32xf32, #tpu.memory_space<vmem>>, vector<1x32x32xf32>
    %61 = vector.shape_cast %60 : vector<1x32x32xf32> to vector<32x32xf32>
    %cst_57 = arith.constant dense<0.000000e+00> : vector<8x32xf32>
    %62 = tpu.matmul %59, %61, %cst_57 {dimension_numbers = #tpu.dot_dimension_numbers<[1], [0], [0], [1], [0, 0, 1, 1], [], []>} : vector<8x32xf32>, vector<32x32xf32>, vector<8x32xf32> -> vector<8x32xf32>
    %c1_58 = arith.constant 1 : index
    %c0_59 = arith.constant 0 : index
    %c0_60 = arith.constant 0 : index
    %63 = vector.load %arg5[%c1_58, %c0_59, %c0_60] : memref<4x1x32xf32, #tpu.memory_space<vmem>>, vector<1x1x32xf32>
    %64 = vector.shape_cast %63 : vector<1x1x32xf32> to vector<1x32xf32>
    %65 = vector.broadcast %64 : vector<1x32xf32> to vector<8x32xf32>
    %66 = arith.addf %62, %65 : vector<8x32xf32>
    %cst_61 = arith.constant 0.000000e+00 : f32
    %67 = vector.broadcast %cst_61 : f32 to vector<8x32xf32>
    %68 = arith.maximumf %66, %67 : vector<8x32xf32>
    %c1_62 = arith.constant 1 : index
    %c0_63 = arith.constant 0 : index
    %c0_64 = arith.constant 0 : index
    %69 = vector.load %arg6[%c1_62, %c0_63, %c0_64] : memref<4x32x48xf32, #tpu.memory_space<vmem>>, vector<1x32x48xf32>
    %70 = vector.shape_cast %69 : vector<1x32x48xf32> to vector<32x48xf32>
    %cst_65 = arith.constant dense<0.000000e+00> : vector<8x48xf32>
    %71 = tpu.matmul %68, %70, %cst_65 {dimension_numbers = #tpu.dot_dimension_numbers<[1], [0], [0], [1], [0, 0, 1, 1], [], []>} : vector<8x32xf32>, vector<32x48xf32>, vector<8x48xf32> -> vector<8x48xf32>
    %c1_66 = arith.constant 1 : index
    %c0_67 = arith.constant 0 : index
    %c0_68 = arith.constant 0 : index
    %72 = vector.load %arg7[%c1_66, %c0_67, %c0_68] : memref<4x1x48xf32, #tpu.memory_space<vmem>>, vector<1x1x48xf32>
    %73 = vector.shape_cast %72 : vector<1x1x48xf32> to vector<1x48xf32>
    %74 = vector.broadcast %73 : vector<1x48xf32> to vector<8x48xf32>
    %75 = arith.addf %71, %74 : vector<8x48xf32>
    %76 = arith.addf %41, %75 : vector<8x48xf32>
    %77 = vector.extract_strided_slice %76 {offsets = [0, 0], sizes = [8, 32], strides = [1, 1]} : vector<8x48xf32> to vector<8x32xf32>
    %c0_69 = arith.constant 0 : index
    %c2_70 = arith.constant 2 : index
    %78 = vector.load %arg9[%c0_69, %c2_70] : memref<8x36xf32, #tpu.memory_space<vmem>>, vector<8x32xf32>
    tpu.vector_store %arg9[%c0_69, %c2_70], %77 {strides = array<i32>} : memref<8x36xf32, #tpu.memory_space<vmem>>, vector<8x32xf32>,
    %c0_71 = arith.constant 0 : index
    %c0_72 = arith.constant 0 : index
    %79 = vector.load %arg9[%c0_71, %c0_72] : memref<8x36xf32, #tpu.memory_space<vmem>>, vector<8x33xf32>
    %c0_73 = arith.constant 0 : index
    %c1_74 = arith.constant 1 : index
    %80 = vector.load %arg9[%c0_73, %c1_74] : memref<8x36xf32, #tpu.memory_space<vmem>>, vector<8x33xf32>
    %81 = arith.maximumf %79, %80 : vector<8x33xf32>
    %c0_75 = arith.constant 0 : index
    %c2_76 = arith.constant 2 : index
    %82 = vector.load %arg9[%c0_75, %c2_76] : memref<8x36xf32, #tpu.memory_space<vmem>>, vector<8x33xf32>
    %83 = arith.maximumf %81, %82 : vector<8x33xf32>
    %c0_77 = arith.constant 0 : index
    %c3_78 = arith.constant 3 : index
    %84 = vector.load %arg9[%c0_77, %c3_78] : memref<8x36xf32, #tpu.memory_space<vmem>>, vector<8x33xf32>
    %85 = arith.maximumf %83, %84 : vector<8x33xf32>
    %c2_79 = arith.constant 2 : index
    %c0_80 = arith.constant 0 : index
    %c0_81 = arith.constant 0 : index
    %86 = vector.load %arg2[%c2_79, %c0_80, %c0_81] : memref<4x33x32xf32, #tpu.memory_space<vmem>>, vector<1x33x32xf32>
    %87 = vector.shape_cast %86 : vector<1x33x32xf32> to vector<33x32xf32>
    %cst_82 = arith.constant dense<0.000000e+00> : vector<8x32xf32>
    %88 = tpu.matmul %85, %87, %cst_82 {dimension_numbers = #tpu.dot_dimension_numbers<[1], [0], [0], [1], [0, 0, 1, 1], [], []>} : vector<8x33xf32>, vector<33x32xf32>, vector<8x32xf32> -> vector<8x32xf32>
    %c2_83 = arith.constant 2 : index
    %c0_84 = arith.constant 0 : index
    %c0_85 = arith.constant 0 : index
    %89 = vector.load %arg3[%c2_83, %c0_84, %c0_85] : memref<4x1x32xf32, #tpu.memory_space<vmem>>, vector<1x1x32xf32>
    %90 = vector.shape_cast %89 : vector<1x1x32xf32> to vector<1x32xf32>
    %91 = vector.broadcast %90 : vector<1x32xf32> to vector<8x32xf32>
    %92 = arith.addf %88, %91 : vector<8x32xf32>
    %cst_86 = arith.constant 0.000000e+00 : f32
    %93 = vector.broadcast %cst_86 : f32 to vector<8x32xf32>
    %94 = arith.maximumf %92, %93 : vector<8x32xf32>
    %c2_87 = arith.constant 2 : index
    %c0_88 = arith.constant 0 : index
    %c0_89 = arith.constant 0 : index
    %95 = vector.load %arg4[%c2_87, %c0_88, %c0_89] : memref<4x32x32xf32, #tpu.memory_space<vmem>>, vector<1x32x32xf32>
    %96 = vector.shape_cast %95 : vector<1x32x32xf32> to vector<32x32xf32>
    %cst_90 = arith.constant dense<0.000000e+00> : vector<8x32xf32>
    %97 = tpu.matmul %94, %96, %cst_90 {dimension_numbers = #tpu.dot_dimension_numbers<[1], [0], [0], [1], [0, 0, 1, 1], [], []>} : vector<8x32xf32>, vector<32x32xf32>, vector<8x32xf32> -> vector<8x32xf32>
    %c2_91 = arith.constant 2 : index
    %c0_92 = arith.constant 0 : index
    %c0_93 = arith.constant 0 : index
    %98 = vector.load %arg5[%c2_91, %c0_92, %c0_93] : memref<4x1x32xf32, #tpu.memory_space<vmem>>, vector<1x1x32xf32>
    %99 = vector.shape_cast %98 : vector<1x1x32xf32> to vector<1x32xf32>
    %100 = vector.broadcast %99 : vector<1x32xf32> to vector<8x32xf32>
    %101 = arith.addf %97, %100 : vector<8x32xf32>
    %cst_94 = arith.constant 0.000000e+00 : f32
    %102 = vector.broadcast %cst_94 : f32 to vector<8x32xf32>
    %103 = arith.maximumf %101, %102 : vector<8x32xf32>
    %c2_95 = arith.constant 2 : index
    %c0_96 = arith.constant 0 : index
    %c0_97 = arith.constant 0 : index
    %104 = vector.load %arg6[%c2_95, %c0_96, %c0_97] : memref<4x32x48xf32, #tpu.memory_space<vmem>>, vector<1x32x48xf32>
    %105 = vector.shape_cast %104 : vector<1x32x48xf32> to vector<32x48xf32>
    %cst_98 = arith.constant dense<0.000000e+00> : vector<8x48xf32>
    %106 = tpu.matmul %103, %105, %cst_98 {dimension_numbers = #tpu.dot_dimension_numbers<[1], [0], [0], [1], [0, 0, 1, 1], [], []>} : vector<8x32xf32>, vector<32x48xf32>, vector<8x48xf32> -> vector<8x48xf32>
    %c2_99 = arith.constant 2 : index
    %c0_100 = arith.constant 0 : index
    %c0_101 = arith.constant 0 : index
    %107 = vector.load %arg7[%c2_99, %c0_100, %c0_101] : memref<4x1x48xf32, #tpu.memory_space<vmem>>, vector<1x1x48xf32>
    %108 = vector.shape_cast %107 : vector<1x1x48xf32> to vector<1x48xf32>
    %109 = vector.broadcast %108 : vector<1x48xf32> to vector<8x48xf32>
    %110 = arith.addf %106, %109 : vector<8x48xf32>
    %111 = arith.addf %76, %110 : vector<8x48xf32>
    %112 = vector.extract_strided_slice %111 {offsets = [0, 0], sizes = [8, 32], strides = [1, 1]} : vector<8x48xf32> to vector<8x32xf32>
    %c0_102 = arith.constant 0 : index
    %c2_103 = arith.constant 2 : index
    %113 = vector.load %arg9[%c0_102, %c2_103] : memref<8x36xf32, #tpu.memory_space<vmem>>, vector<8x32xf32>
    tpu.vector_store %arg9[%c0_102, %c2_103], %112 {strides = array<i32>} : memref<8x36xf32, #tpu.memory_space<vmem>>, vector<8x32xf32>,
    %c0_104 = arith.constant 0 : index
    %c0_105 = arith.constant 0 : index
    %114 = vector.load %arg9[%c0_104, %c0_105] : memref<8x36xf32, #tpu.memory_space<vmem>>, vector<8x33xf32>
    %c0_106 = arith.constant 0 : index
    %c1_107 = arith.constant 1 : index
    %115 = vector.load %arg9[%c0_106, %c1_107] : memref<8x36xf32, #tpu.memory_space<vmem>>, vector<8x33xf32>
    %116 = arith.maximumf %114, %115 : vector<8x33xf32>
    %c0_108 = arith.constant 0 : index
    %c2_109 = arith.constant 2 : index
    %117 = vector.load %arg9[%c0_108, %c2_109] : memref<8x36xf32, #tpu.memory_space<vmem>>, vector<8x33xf32>
    %118 = arith.maximumf %116, %117 : vector<8x33xf32>
    %c0_110 = arith.constant 0 : index
    %c3_111 = arith.constant 3 : index
    %119 = vector.load %arg9[%c0_110, %c3_111] : memref<8x36xf32, #tpu.memory_space<vmem>>, vector<8x33xf32>
    %120 = arith.maximumf %118, %119 : vector<8x33xf32>
    %c3_112 = arith.constant 3 : index
    %c0_113 = arith.constant 0 : index
    %c0_114 = arith.constant 0 : index
    %121 = vector.load %arg2[%c3_112, %c0_113, %c0_114] : memref<4x33x32xf32, #tpu.memory_space<vmem>>, vector<1x33x32xf32>
    %122 = vector.shape_cast %121 : vector<1x33x32xf32> to vector<33x32xf32>
    %cst_115 = arith.constant dense<0.000000e+00> : vector<8x32xf32>
    %123 = tpu.matmul %120, %122, %cst_115 {dimension_numbers = #tpu.dot_dimension_numbers<[1], [0], [0], [1], [0, 0, 1, 1], [], []>} : vector<8x33xf32>, vector<33x32xf32>, vector<8x32xf32> -> vector<8x32xf32>
    %c3_116 = arith.constant 3 : index
    %c0_117 = arith.constant 0 : index
    %c0_118 = arith.constant 0 : index
    %124 = vector.load %arg3[%c3_116, %c0_117, %c0_118] : memref<4x1x32xf32, #tpu.memory_space<vmem>>, vector<1x1x32xf32>
    %125 = vector.shape_cast %124 : vector<1x1x32xf32> to vector<1x32xf32>
    %126 = vector.broadcast %125 : vector<1x32xf32> to vector<8x32xf32>
    %127 = arith.addf %123, %126 : vector<8x32xf32>
    %cst_119 = arith.constant 0.000000e+00 : f32
    %128 = vector.broadcast %cst_119 : f32 to vector<8x32xf32>
    %129 = arith.maximumf %127, %128 : vector<8x32xf32>
    %c3_120 = arith.constant 3 : index
    %c0_121 = arith.constant 0 : index
    %c0_122 = arith.constant 0 : index
    %130 = vector.load %arg4[%c3_120, %c0_121, %c0_122] : memref<4x32x32xf32, #tpu.memory_space<vmem>>, vector<1x32x32xf32>
    %131 = vector.shape_cast %130 : vector<1x32x32xf32> to vector<32x32xf32>
    %cst_123 = arith.constant dense<0.000000e+00> : vector<8x32xf32>
    %132 = tpu.matmul %129, %131, %cst_123 {dimension_numbers = #tpu.dot_dimension_numbers<[1], [0], [0], [1], [0, 0, 1, 1], [], []>} : vector<8x32xf32>, vector<32x32xf32>, vector<8x32xf32> -> vector<8x32xf32>
    %c3_124 = arith.constant 3 : index
    %c0_125 = arith.constant 0 : index
    %c0_126 = arith.constant 0 : index
    %133 = vector.load %arg5[%c3_124, %c0_125, %c0_126] : memref<4x1x32xf32, #tpu.memory_space<vmem>>, vector<1x1x32xf32>
    %134 = vector.shape_cast %133 : vector<1x1x32xf32> to vector<1x32xf32>
    %135 = vector.broadcast %134 : vector<1x32xf32> to vector<8x32xf32>
    %136 = arith.addf %132, %135 : vector<8x32xf32>
    %cst_127 = arith.constant 0.000000e+00 : f32
    %137 = vector.broadcast %cst_127 : f32 to vector<8x32xf32>
    %138 = arith.maximumf %136, %137 : vector<8x32xf32>
    %c3_128 = arith.constant 3 : index
    %c0_129 = arith.constant 0 : index
    %c0_130 = arith.constant 0 : index
    %139 = vector.load %arg6[%c3_128, %c0_129, %c0_130] : memref<4x32x48xf32, #tpu.memory_space<vmem>>, vector<1x32x48xf32>
    %140 = vector.shape_cast %139 : vector<1x32x48xf32> to vector<32x48xf32>
    %cst_131 = arith.constant dense<0.000000e+00> : vector<8x48xf32>
    %141 = tpu.matmul %138, %140, %cst_131 {dimension_numbers = #tpu.dot_dimension_numbers<[1], [0], [0], [1], [0, 0, 1, 1], [], []>} : vector<8x32xf32>, vector<32x48xf32>, vector<8x48xf32> -> vector<8x48xf32>
    %c3_132 = arith.constant 3 : index
    %c0_133 = arith.constant 0 : index
    %c0_134 = arith.constant 0 : index
    %142 = vector.load %arg7[%c3_132, %c0_133, %c0_134] : memref<4x1x48xf32, #tpu.memory_space<vmem>>, vector<1x1x48xf32>
    %143 = vector.shape_cast %142 : vector<1x1x48xf32> to vector<1x48xf32>
    %144 = vector.broadcast %143 : vector<1x48xf32> to vector<8x48xf32>
    %145 = arith.addf %141, %144 : vector<8x48xf32>
    %146 = arith.addf %111, %145 : vector<8x48xf32>
    %c0_135 = arith.constant 0 : index
    %c0_136 = arith.constant 0 : index
    %147 = vector.load %arg8[%c0_135, %c0_136] : memref<8x48xf32, #tpu.memory_space<vmem>>, vector<8x48xf32>
    tpu.vector_store %arg8[%c0_135, %c0_136], %146 {strides = array<i32>} : memref<8x48xf32, #tpu.memory_space<vmem>>, vector<8x48xf32>,
    return
  }
  func.func @transform_0(%arg0: i32) -> (i32, i32) {
    %c0_i32 = arith.constant 0 : i32
    %c0_i32_0 = arith.constant 0 : i32
    return %arg0, %c0_i32 : i32, i32
  }
  func.func @transform_1(%arg0: i32) -> (i32, i32, i32) {
    %c0_i32 = arith.constant 0 : i32
    %c0_i32_0 = arith.constant 0 : i32
    %c0_i32_1 = arith.constant 0 : i32
    %c0_i32_2 = arith.constant 0 : i32
    return %c0_i32, %c0_i32_0, %c0_i32_1 : i32, i32, i32
  }
  func.func @transform_2(%arg0: i32) -> (i32, i32, i32) {
    %c0_i32 = arith.constant 0 : i32
    %c0_i32_0 = arith.constant 0 : i32
    %c0_i32_1 = arith.constant 0 : i32
    %c0_i32_2 = arith.constant 0 : i32
    return %c0_i32, %c0_i32_0, %c0_i32_1 : i32, i32, i32
  }
  func.func @transform_3(%arg0: i32) -> (i32, i32, i32) {
    %c0_i32 = arith.constant 0 : i32
    %c0_i32_0 = arith.constant 0 : i32
    %c0_i32_1 = arith.constant 0 : i32
    %c0_i32_2 = arith.constant 0 : i32
    return %c0_i32, %c0_i32_0, %c0_i32_1 : i32, i32, i32
  }
  func.func @transform_4(%arg0: i32) -> (i32, i32, i32) {
    %c0_i32 = arith.constant 0 : i32
    %c0_i32_0 = arith.constant 0 : i32
    %c0_i32_1 = arith.constant 0 : i32
    %c0_i32_2 = arith.constant 0 : i32
    return %c0_i32, %c0_i32_0, %c0_i32_1 : i32, i32, i32
  }
  func.func @transform_5(%arg0: i32) -> (i32, i32, i32) {
    %c0_i32 = arith.constant 0 : i32
    %c0_i32_0 = arith.constant 0 : i32
    %c0_i32_1 = arith.constant 0 : i32
    %c0_i32_2 = arith.constant 0 : i32
    return %c0_i32, %c0_i32_0, %c0_i32_1 : i32, i32, i32
  }
  func.func @transform_6(%arg0: i32) -> (i32, i32, i32) {
    %c0_i32 = arith.constant 0 : i32
    %c0_i32_0 = arith.constant 0 : i32
    %c0_i32_1 = arith.constant 0 : i32
    %c0_i32_2 = arith.constant 0 : i32
    return %c0_i32, %c0_i32_0, %c0_i32_1 : i32, i32, i32
  }
  func.func @transform_7(%arg0: i32) -> (i32, i32) {
    %c0_i32 = arith.constant 0 : i32
    %c0_i32_0 = arith.constant 0 : i32
    return %arg0, %c0_i32 : i32, i32
  }
}

</mosaic_0001>

<bundles_post_ra>
// kernel: tpu_custom_call.1
= control target key start
LH: loop header
LB: loop body
LE: loop exit
PB: predicated region body
PF: predicated region fallthrough
CT: control target
= control target key end

     0   :  { %vm32_vm0 = vcmask 261120   ;;  %vm27_vm1 = vcmask 15360   ;;  %vm29_vm2 = vcmask 294160   ;;  %s1568_s26 = smov 2   ;;  %v1569_v2 = vmov -3.4028235e+38   ;;  %s1929_s0 = inlined_call_operand.vmem [shape: f32[8,32], index: 0, kind: input, shape index: {}]   ;;  %s1930_s1 = inlined_call_operand.vmem [shape: f32[4,33,32], index: 1, kind: input, shape index: {}]   ;;  %s1931_s2 = inlined_call_operand.vmem [shape: f32[4,1,32], index: 2, kind: input, shape index: {}]   ;;  %s1932_s3 = inlined_call_operand.vmem [shape: f32[4,32,32], index: 3, kind: input, shape index: {}]   ;;  %s1933_s4 = inlined_call_operand.vmem [shape: f32[4,1,32], index: 4, kind: input, shape index: {}]   ;;  %s1934_s5 = inlined_call_operand.vmem [shape: f32[4,32,48], index: 5, kind: input, shape index: {}]   ;;  %s1935_s6 = inlined_call_operand.vmem [shape: f32[4,1,48], index: 6, kind: input, shape index: {}]   ;;  %s1936_s7 = inlined_call_operand.hbm [shape: f32[8,48], index: 7, kind: output, shape index: {}]  }
   0x1   :  { %v31_v0 = vld [vmem:[%s1929_s0] sm:$0xff]  ;;  %28 = vst.msk [vmem:[#allocation2] sm:$0xff] %vm27_vm1, %v1569_v2  ;;  %v1570_v3 = vmov 0.0|0.0   ;;  %v55_v5 = vld [vmem:[%s1930_s1 + $0x8] sm:$0xff] }
   0x2   :  { %v1621_v1 = vsel %vm32_vm0, %v31_v0, 0.0  ;;  %1463 = vmatprep.subr.bf16.mxu0 %v1570_v3  ;;  %v54_v4 = vld [vmem:[%s1930_s1] sm:$0xff] }
   0x3   :  { %35 = vrot.lane.b32.xlu0 %v1621_v1, %s1568_s26 }
   0x4   :  { %12 = vsyncpa [#allocation4], 0  ;;  %30 = vst.msk [vmem:[#allocation2] sm:$0xff] %vm29_vm2, %v1569_v2  ;;  %v1464_v6 = vpack.c.bf16 %v55_v5, %v54_v4  ;;  %1469 = vmatprep.subr.bf16.mxu1 %v1570_v3  ;;  %v56_v7 = vld [vmem:[%s1930_s1 + $0x10] sm:$0xff]  ;;  %v57_v8 = vld [vmem:[%s1930_s1 + $0x18] sm:$0xff]  ;;  %vm38_vm3 = vcmask 277520  }
   0x5   :  { %v1467_v9 = vpack.c.bf16 %v57_v8, %v56_v7  ;;  %v1571_v11 = vmov 0.0   ;;  %v58_v12 = vld [vmem:[%s1930_s1 + $0x20] sm:$0x1]  ;;  %vm70_vm4 = vcmask 1040384   ;;  %vm1572_vm5 = vmmov 0   ;;  %v146_v14 = vld [vmem:[%s1932_s3 + $0x8] sm:$0xff] }
   0x6   :  { %1465 = vmatpush3.bf16.msra.mxu0 %v1464_v6  ;;  %1333 = vmatprep.mubr.msk.f32.mxu0 %vm1572_vm5, %v1571_v11  ;;  %v145_v13 = vld [vmem:[%s1932_s3] sm:$0xff]  ;;  %s1573_s17 = smov 126   ;;  %s1574_s18 = smov 127   ;;  %vm66_vm6 = vcmask 269312   ;;  %v147_v23 = vld [vmem:[%s1932_s3 + $0x10] sm:$0xff]  ;;  %v148_v24 = vld [vmem:[%s1932_s3 + $0x18] sm:$0xff] }
   0x7   :  { %1466 = vmatprep.subr.bf16.mxu0 %v1570_v3  ;;  %1344 = vmatprep.mubr.msk.f32.mxu1 %vm1572_vm5, %v1571_v11  ;;  %v1470_v15 = vpack.c.bf16 %v146_v14, %v145_v13  ;;  %s1575_s19 = smov 125   ;;  %v1473_v25 = vpack.c.bf16 %v148_v24, %v147_v23  ;;  %v1183_v26 = vld [vmem:[%s1931_s2] ss:$0 sm:$0xff]  ;;  %v231_v28 = vld [vmem:[%s1934_s5 + $0x8] sm:$0xff]  ;;  %v232_v34 = vld [vmem:[%s1934_s5 + $0x10] sm:$0xff]  ;;  %s1576_s28 = smov [#allocation3]  }
   0x8   :  { %v230_v27 = vld [vmem:[%s1934_s5] sm:$0xff]  ;;  %v233_v35 = vld [vmem:[%s1934_s5 + $0x18] sm:$0xff]  ;;  %v1190_v47 = vld [vmem:[%s1930_s1 + $0x28] sm:$0xff]  ;;  %s1175_s0 = sshll.u32 %s1576_s28, 4  ;;  %vm1167_vm7 = vcmask 392192   ;;  %s1176_s0 = int_to_ptr.vmem [resolvable:$true] %s1175_s0 }
   0x9   :  { %1471 = vmatpush3.bf16.msra.mxu1 %v1470_v15  ;;  %v1476_v32 = vpack.c.bf16 %v231_v28, %v230_v27  ;;  %v1479_v36 = vpack.c.bf16 %v233_v35, %v232_v34  ;;  %v1186_v37 = vld [vmem:[%s1933_s4] ss:$0 sm:$0xff]  ;;  %v1191_v48 = vld [vmem:[%s1930_s1 + $0x30] sm:$0xff]  ;;  %v1192_v50 = vld [vmem:[%s1930_s1 + $0x38] sm:$0xff]  ;;  %p1549_p1 = scmp.lt.s32.totalorder %s1176_s0, %s1176_s0 }
   0xa   :  { %1468 = vmatpush3.bf16.msra.mxu0 %v1467_v9  ;;  %1472 = vmatprep.subr.bf16.mxu1 %v1570_v3  ;;  %v1188_v42 = vld [vmem:[%s1935_s6] ss:$0 sm:$0xff]  ;;  %v1482_v49 = vpack.c.bf16 %v1191_v48, %v1190_v47  ;;  %v1194_v54 = vld [vmem:[%s1930_s1 + $0x48] sm:$0x1]  ;;  %v1202_v2 = vld [vmem:[%s1932_s3 + $0x38] sm:$0xff] }
   0xb   :  { %1331 = vmatprep.subr.mxu0 %v1571_v11  ;;  %v1193_v51 = vld [vmem:[%s1930_s1 + $0x40] sm:$0xff]  ;;  %v1200_v56 = vld [vmem:[%s1932_s3 + $0x28] sm:$0xff]  ;;  %v1208_v14 = vld [vmem:[%s1934_s5 + $0x30] sm:$0xff] }
   0xc   :  { %v1485_v52 = vpack.c.bf16 %v1193_v51, %v1192_v50  ;;  %v1199_v55 = vld [vmem:[%s1932_s3 + $0x20] sm:$0xff]  ;;  %v1207_v6 = vld [vmem:[%s1934_s5 + $0x28] sm:$0xff]  ;;  %v1209_v15 = vld [vmem:[%s1934_s5 + $0x38] sm:$0xff] }
   0xd   :  { %1474 = vmatpush3.bf16.msra.mxu1 %v1473_v25  ;;  %v1488_v57 = vpack.c.bf16 %v1200_v56, %v1199_v55  ;;  %v1206_v5 = vld [vmem:[%s1934_s5 + $0x20] sm:$0xff]  ;;  %v1213_v27 = vld [vmem:[%s1930_s1 + $0x50] sm:$0xff]  ;;  %v1214_v28 = vld [vmem:[%s1930_s1 + $0x58] sm:$0xff] }
   0xe   :  { %1332 = vmatpush3.msk.msra.mxu0 %vm70_vm4, %v58_v12  ;;  %1475 = vmatprep.subr.bf16.mxu1 %v1570_v3  ;;  %v1494_v7 = vpack.c.bf16 %v1207_v6, %v1206_v5  ;;  %v1196_v8 = vld [vmem:[%s1931_s2 + $0x1] ss:$0 sm:$0xff]  ;;  %v1217_v34 = vld [vmem:[%s1930_s1 + $0x70] sm:$0x1]  ;;  %v1219_v51 = vld [vmem:[%s1931_s2 + $0x2] ss:$0 sm:$0xff] }
   0xf   :  { %1481 = vmatprep.subr.bf16.mxu0 %v1570_v3  ;;  %v1222_v35 = vld [vmem:[%s1932_s3 + $0x40] sm:$0xff]  ;;  %v1231_v56 = vld [vmem:[%s1934_s5 + $0x50] sm:$0xff]  ;;  %v1236_v6 = vld [vmem:[%s1930_s1 + $0x78] sm:$0xff] }
  0x10   :  { %v1229_v48 = vld [vmem:[%s1934_s5 + $0x40] sm:$0xff] }
  0x75   :  { %v36_v10 = vpop.permute.xlu0 %35 }
  0x76   :  { %39 = vst.msk [vmem:[#allocation2] sm:$0xff] %vm38_vm3, %v36_v10 }
  0x7d   :  { %v40_v16 = vld [vmem:[#allocation2] sm:$0xff] }
  0x7e   :  { %46 = vrot.lane.b32.xlu1 %v40_v16, %s1573_s17  ;;  %42 = vrot.lane.b32.xlu0 %v40_v16, %s1574_s18 }
  0x82   :  { %50 = vrot.lane.b32.xlu1 %v40_v16, %s1575_s19 }
  0xf0   :  { %v47_v17 = vpop.permute.xlu1 %46  ;;  %v43_v18 = vpop.permute.xlu0 %42 }
  0xf1   :  { %v45_v19 = vmax.f32 %v40_v16, %v43_v18  ;;  %v1497_v16 = vpack.c.bf16 %v1209_v15, %v1208_v14  ;;  %v1240_v14 = vld [vmem:[%s1930_s1 + $0x98] sm:$0x1]  ;;  %v1245_v15 = vld [vmem:[%s1932_s3 + $0x60] sm:$0xff] }
  0xf3   :  { %v49_v20 = vmax.f32 %v45_v19, %v47_v17  ;;  %v1204_v17 = vld [vmem:[%s1933_s4 + $0x1] ss:$0 sm:$0xff] }
  0xf4   :  { %v51_v21 = vpop.permute.xlu1 %50 }
  0xf5   :  { %v53_v22 = vmax.f32 %v49_v20, %v51_v21 }
  0xf7   :  { %1334 = vmatmul.mubr.msk.f32.vlgmr.msra.gmra.mrb[0].mxu0 %vm66_vm6, %v53_v22  ;;  %v1211_v22 = vld [vmem:[%s1935_s6 + $0x1] ss:$0 sm:$0xff] }
  0xf8   :  { %1368 = vmatprep.mubr.msk.f32.mxu0 %vm1572_vm5, %v1571_v11  ;;  %1483 = vmatpush3.bf16.msra.mxu0 %v1482_v49  ;;  %v1230_v49 = vld [vmem:[%s1934_s5 + $0x48] sm:$0xff] }
  0xf9   :  { %1484 = vmatprep.subr.bf16.mxu0 %v1570_v3  ;;  %v1512_v50 = vpack.c.bf16 %v1230_v49, %v1229_v48 }
  0xfc   :  { %1486 = vmatpush3.bf16.msra.mxu0 %v1485_v52 }
  0xfd   :  { %1366 = vmatprep.subr.mxu0 %v1571_v11 }
 0x100   :  { %1367 = vmatpush3.msk.msra.mxu0 %vm70_vm4, %v1194_v54 }
 0x101   :  { %1493 = vmatprep.subr.bf16.mxu0 %v1570_v3 }
 0x1ca   :  { %v140_v29 = vpop.f32.mrb[0].mxu0 }
 0x1cb   :  { %v141_v30 = vadd.f32 %v1183_v26, %v140_v29  ;;  %v1335_v31 = vpop.f32.mrb[1].mxu0  ;;  %v1500_v29 = vpack.c.bf16 %v1214_v28, %v1213_v27  ;;  %v1252_v28 = vld [vmem:[%s1934_s5 + $0x60] sm:$0xff] }
 0x1cc   :  { %v1216_v31 = vld [vmem:[%s1930_s1 + $0x68] sm:$0xff] }
 0x1cd   :  { %v144_v33 = vmax.f32 %v141_v30, 0.0  ;;  %v1215_v30 = vld [vmem:[%s1930_s1 + $0x60] sm:$0xff] }
 0x1cf   :  { %1345 = vmatmul.mubr.msk.f32.vlgmr.msra.gmra.mrb[0].mxu1 %vm32_vm0, %v144_v33 }
 0x1d0   :  { %1477 = vmatpush3.bf16.msra.mxu1 %v1476_v32  ;;  %1355 = vmatprep.mubr.msk.f32.mxu1 %vm1572_vm5, %v1571_v11  ;;  %v1503_v32 = vpack.c.bf16 %v1216_v31, %v1215_v30 }
 0x1d1   :  { %1478 = vmatprep.subr.bf16.mxu1 %v1570_v3 }
 0x1d4   :  { %1480 = vmatpush3.bf16.msra.mxu1 %v1479_v36  ;;  %v1223_v36 = vld [vmem:[%s1932_s3 + $0x48] sm:$0xff] }
 0x1d5   :  { %1487 = vmatprep.subr.bf16.mxu1 %v1570_v3 }
 0x2a2   :  { %v225_v38 = vpop.f32.mrb[0].mxu1 }
 0x2a3   :  { %v226_v39 = vadd.f32 %v1186_v37, %v225_v38  ;;  %v1346_v40 = vpop.f32.mrb[1].mxu1  ;;  %v1506_v37 = vpack.c.bf16 %v1223_v36, %v1222_v35  ;;  %v1254_v35 = vld [vmem:[%s1934_s5 + $0x70] sm:$0xff]  ;;  %v1255_v36 = vld [vmem:[%s1934_s5 + $0x78] sm:$0xff] }
 0x2a5   :  { %v229_v41 = vmax.f32 %v226_v39, 0.0 }
 0x2a7   :  { %1356 = vmatmul.mubr.msk.f32.vlgmr.msra.gmra.mrb[2].mxu1 %vm32_vm0, %v229_v41 }
 0x2a8   :  { %1379 = vmatprep.mubr.msk.f32.mxu1 %vm1572_vm5, %v1571_v11  ;;  %1489 = vmatpush3.bf16.msra.mxu1 %v1488_v57  ;;  %v1232_v57 = vld [vmem:[%s1934_s5 + $0x58] sm:$0xff] }
 0x2a9   :  { %1490 = vmatprep.subr.bf16.mxu1 %v1570_v3 }
 0x37a   :  { %v310_v43 = vpop.f32.mrb[2].mxu1 }
 0x37b   :  { %v311_v44 = vadd.f32 %v1188_v42, %v310_v43  ;;  %v1357_v45 = vpop.f32.mrb[3].mxu1 }
 0x37c   :  { %v1224_v45 = vld [vmem:[%s1932_s3 + $0x50] sm:$0xff] }
 0x37d   :  { %v1701_v46 = vadd.f32 %v311_v44, %v1621_v1  ;;  %v1201_v1 = vld [vmem:[%s1932_s3 + $0x30] sm:$0xff] }
 0x37e   :  { %v1491_v4 = vpack.c.bf16 %v1202_v2, %v1201_v1 }
 0x37f   :  { %316 = vrot.lane.b32.xlu0 %v1701_v46, %s1568_s26 }
 0x380   :  { %1492 = vmatpush3.bf16.msra.mxu1 %v1491_v4 }
 0x381   :  { %1499 = vmatprep.subr.bf16.mxu1 %v1570_v3 }
 0x3f1   :  { %v317_v53 = vpop.permute.xlu0 %316 }
 0x3f2   :  { %319 = vst.msk [vmem:[#allocation2] sm:$0xff] %vm38_vm3, %v317_v53 }
 0x3f9   :  { %v320_v58 = vld [vmem:[#allocation2] sm:$0xff] }
 0x3fa   :  { %326 = vrot.lane.b32.xlu0 %v320_v58, %s1573_s17  ;;  %322 = vrot.lane.b32.xlu1 %v320_v58, %s1574_s18 }
 0x3fe   :  { %330 = vrot.lane.b32.xlu1 %v320_v58, %s1575_s19 }
 0x46c   :  { %v323_v59 = vpop.permute.xlu1 %322  ;;  %v327_v61 = vpop.permute.xlu0 %326 }
 0x46d   :  { %v325_v60 = vmax.f32 %v320_v58, %v323_v59  ;;  %v1515_v58 = vpack.c.bf16 %v1232_v57, %v1231_v56  ;;  %v1227_v59 = vld [vmem:[%s1933_s4 + $0x2] ss:$0 sm:$0xff] }
 0x46f   :  { %v329_v62 = vmax.f32 %v325_v60, %v327_v61 }
 0x470   :  { %v331_v63 = vpop.permute.xlu1 %330 }
 0x471   :  { %v333_v0 = vmax.f32 %v329_v62, %v331_v63 }
 0x473   :  { %1369 = vmatmul.mubr.msk.f32.vlgmr.msra.gmra.mrb[2].mxu0 %vm66_vm6, %v333_v0  ;;  %v1234_v0 = vld [vmem:[%s1935_s6 + $0x2] ss:$0 sm:$0xff] }
 0x474   :  { %1390 = vmatprep.mubr.msk.f32.mxu0 %vm1572_vm5, %v1571_v11  ;;  %1495 = vmatpush3.bf16.msra.mxu0 %v1494_v7  ;;  %v1237_v7 = vld [vmem:[%s1930_s1 + $0x80] sm:$0xff] }
 0x475   :  { %1496 = vmatprep.subr.bf16.mxu0 %v1570_v3 }
 0x478   :  { %1498 = vmatpush3.bf16.msra.mxu0 %v1497_v16  ;;  %v1246_v16 = vld [vmem:[%s1932_s3 + $0x68] sm:$0xff] }
 0x479   :  { %1505 = vmatprep.subr.bf16.mxu0 %v1570_v3 }
 0x546   :  { %v420_v9 = vpop.f32.mrb[2].mxu0 }
 0x547   :  { %v421_v10 = vadd.f32 %v1196_v8, %v420_v9  ;;  %v1370_v12 = vpop.f32.mrb[3].mxu0  ;;  %v1518_v8 = vpack.c.bf16 %v1237_v7, %v1236_v6  ;;  %v1238_v9 = vld [vmem:[%s1930_s1 + $0x88] sm:$0xff] }
 0x549   :  { %v424_v13 = vmax.f32 %v421_v10, 0.0  ;;  %v1239_v10 = vld [vmem:[%s1930_s1 + $0x90] sm:$0xff] }
 0x54a   :  { %v1521_v12 = vpack.c.bf16 %v1239_v10, %v1238_v9 }
 0x54b   :  { %1380 = vmatmul.mubr.msk.f32.vlgmr.msra.gmra.mrb[4].mxu1 %vm32_vm0, %v424_v13 }
 0x54c   :  { %1403 = vmatprep.mubr.msk.f32.mxu1 %vm1572_vm5, %v1571_v11  ;;  %1501 = vmatpush3.bf16.msra.mxu1 %v1500_v29  ;;  %v1253_v29 = vld [vmem:[%s1934_s5 + $0x68] sm:$0xff] }
 0x54d   :  { %1502 = vmatprep.subr.bf16.mxu1 %v1570_v3  ;;  %v1530_v30 = vpack.c.bf16 %v1253_v29, %v1252_v28 }
 0x550   :  { %1504 = vmatpush3.bf16.msra.mxu1 %v1503_v32 }
 0x551   :  { %1401 = vmatprep.subr.mxu1 %v1571_v11 }
 0x554   :  { %1402 = vmatpush3.msk.msra.mxu1 %vm70_vm4, %v1217_v34 }
 0x555   :  { %1511 = vmatprep.subr.bf16.mxu1 %v1570_v3 }
 0x61e   :  { %v507_v18 = vpop.f32.mrb[4].mxu1 }
 0x61f   :  { %v508_v19 = vadd.f32 %v1204_v17, %v507_v18  ;;  %v1381_v20 = vpop.f32.mrb[5].mxu1  ;;  %v1524_v17 = vpack.c.bf16 %v1246_v16, %v1245_v15 }
 0x621   :  { %v511_v21 = vmax.f32 %v508_v19, 0.0 }
 0x623   :  { %1391 = vmatmul.mubr.msk.f32.vlgmr.msra.gmra.mrb[4].mxu0 %vm32_vm0, %v511_v21 }
 0x624   :  { %1414 = vmatprep.mubr.msk.f32.mxu0 %vm1572_vm5, %v1571_v11  ;;  %1507 = vmatpush3.bf16.msra.mxu0 %v1506_v37  ;;  %v1533_v37 = vpack.c.bf16 %v1255_v36, %v1254_v35 }
 0x625   :  { %1508 = vmatprep.subr.bf16.mxu0 %v1570_v3 }
 0x6f6   :  { %v594_v23 = vpop.f32.mrb[4].mxu0 }
 0x6f7   :  { %v595_v24 = vadd.f32 %v1211_v22, %v594_v23  ;;  %v1392_v25 = vpop.f32.mrb[5].mxu0 }
 0x6f8   :  { %v1247_v25 = vld [vmem:[%s1932_s3 + $0x70] sm:$0xff] }
 0x6f9   :  { %v1775_v26 = vadd.f32 %v595_v24, %v1701_v46  ;;  %v1225_v46 = vld [vmem:[%s1932_s3 + $0x58] sm:$0xff] }
 0x6fa   :  { %v1509_v47 = vpack.c.bf16 %v1225_v46, %v1224_v45 }
 0x6fb   :  { %600 = vrot.lane.b32.xlu0 %v1775_v26, %s1568_s26 }
 0x6fc   :  { %1510 = vmatpush3.bf16.msra.mxu0 %v1509_v47 }
 0x6fd   :  { %1517 = vmatprep.subr.bf16.mxu0 %v1570_v3 }
 0x76d   :  { %v601_v33 = vpop.permute.xlu0 %600 }
 0x76e   :  { %603 = vst.msk [vmem:[#allocation2] sm:$0xff] %vm38_vm3, %v601_v33 }
 0x775   :  { %v604_v38 = vld [vmem:[#allocation2] sm:$0xff] }
 0x776   :  { %610 = vrot.lane.b32.xlu0 %v604_v38, %s1573_s17  ;;  %606 = vrot.lane.b32.xlu1 %v604_v38, %s1574_s18 }
 0x77a   :  { %614 = vrot.lane.b32.xlu1 %v604_v38, %s1575_s19 }
 0x7e8   :  { %v607_v39 = vpop.permute.xlu1 %606  ;;  %v611_v41 = vpop.permute.xlu0 %610 }
 0x7e9   :  { %v609_v40 = vmax.f32 %v604_v38, %v607_v39 }
 0x7eb   :  { %v613_v42 = vmax.f32 %v609_v40, %v611_v41 }
 0x7ec   :  { %v615_v43 = vpop.permute.xlu1 %614 }
 0x7ed   :  { %v617_v44 = vmax.f32 %v613_v42, %v615_v43  ;;  %v1257_v42 = vld [vmem:[%s1935_s6 + $0x3] ss:$0 sm:$0xff] }
 0x7ef   :  { %1404 = vmatmul.mubr.msk.f32.vlgmr.msra.gmra.mrb[6].mxu1 %vm66_vm6, %v617_v44 }
 0x7f0   :  { %1425 = vmatprep.mubr.msk.f32.mxu1 %vm1572_vm5, %v1571_v11  ;;  %1513 = vmatpush3.bf16.msra.mxu1 %v1512_v50 }
 0x7f1   :  { %1514 = vmatprep.subr.bf16.mxu1 %v1570_v3 }
 0x7f4   :  { %1516 = vmatpush3.bf16.msra.mxu1 %v1515_v58 }
 0x7f5   :  { %1523 = vmatprep.subr.bf16.mxu1 %v1570_v3 }
 0x8c2   :  { %v704_v52 = vpop.f32.mrb[6].mxu1 }
 0x8c3   :  { %v705_v53 = vadd.f32 %v1219_v51, %v704_v52  ;;  %v1405_v54 = vpop.f32.mrb[7].mxu1 }
 0x8c5   :  { %v708_v55 = vmax.f32 %v705_v53, 0.0 }
 0x8c7   :  { %1415 = vmatmul.mubr.msk.f32.vlgmr.msra.gmra.mrb[6].mxu0 %vm32_vm0, %v708_v55 }
 0x8c8   :  { %1438 = vmatprep.mubr.msk.f32.mxu0 %vm1572_vm5, %v1571_v11  ;;  %1519 = vmatpush3.bf16.msra.mxu0 %v1518_v8 }
 0x8c9   :  { %1520 = vmatprep.subr.bf16.mxu0 %v1570_v3 }
 0x8cc   :  { %1522 = vmatpush3.bf16.msra.mxu0 %v1521_v12 }
 0x8cd   :  { %1436 = vmatprep.subr.mxu0 %v1571_v11 }
 0x8d0   :  { %1437 = vmatpush3.msk.msra.mxu0 %vm70_vm4, %v1240_v14 }
 0x8d1   :  { %1529 = vmatprep.subr.bf16.mxu0 %v1570_v3 }
 0x99a   :  { %v791_v60 = vpop.f32.mrb[6].mxu0 }
 0x99b   :  { %v792_v61 = vadd.f32 %v1227_v59, %v791_v60  ;;  %v1416_v62 = vpop.f32.mrb[7].mxu0 }
 0x99d   :  { %v795_v63 = vmax.f32 %v792_v61, 0.0 }
 0x99f   :  { %1426 = vmatmul.mubr.msk.f32.vlgmr.msra.gmra.mrb[8].mxu1 %vm32_vm0, %v795_v63 }
 0x9a0   :  { %1449 = vmatprep.mubr.msk.f32.mxu1 %vm1572_vm5, %v1571_v11  ;;  %1525 = vmatpush3.bf16.msra.mxu1 %v1524_v17 }
 0x9a1   :  { %1526 = vmatprep.subr.bf16.mxu1 %v1570_v3 }
 0xa72   :  { %v878_v1 = vpop.f32.mrb[8].mxu1 }
 0xa73   :  { %v879_v2 = vadd.f32 %v1234_v0, %v878_v1  ;;  %v1427_v4 = vpop.f32.mrb[9].mxu1 }
 0xa75   :  { %v1849_v5 = vadd.f32 %v879_v2, %v1775_v26  ;;  %v1248_v26 = vld [vmem:[%s1932_s3 + $0x78] sm:$0xff] }
 0xa76   :  { %v1527_v27 = vpack.c.bf16 %v1248_v26, %v1247_v25 }
 0xa77   :  { %884 = vrot.lane.b32.xlu0 %v1849_v5, %s1568_s26 }
 0xa78   :  { %1528 = vmatpush3.bf16.msra.mxu1 %v1527_v27 }
 0xae9   :  { %v885_v13 = vpop.permute.xlu0 %884 }
 0xaea   :  { %887 = vst.msk [vmem:[#allocation2] sm:$0xff] %vm38_vm3, %v885_v13 }
 0xaf1   :  { %v888_v18 = vld [vmem:[#allocation2] sm:$0xff] }
 0xaf2   :  { %894 = vrot.lane.b32.xlu0 %v888_v18, %s1573_s17  ;;  %890 = vrot.lane.b32.xlu1 %v888_v18, %s1574_s18 }
 0xaf6   :  { %898 = vrot.lane.b32.xlu1 %v888_v18, %s1575_s19 }
 0xb64   :  { %v891_v19 = vpop.permute.xlu1 %890  ;;  %v895_v21 = vpop.permute.xlu0 %894 }
 0xb65   :  { %v893_v20 = vmax.f32 %v888_v18, %v891_v19 }
 0xb67   :  { %v897_v22 = vmax.f32 %v893_v20, %v895_v21 }
 0xb68   :  { %v899_v23 = vpop.permute.xlu1 %898 }
 0xb69   :  { %v901_v24 = vmax.f32 %v897_v22, %v899_v23 }
 0xb6b   :  { %1439 = vmatmul.mubr.msk.f32.vlgmr.msra.gmra.mrb[8].mxu0 %vm66_vm6, %v901_v24 }
 0xb6c   :  { %1460 = vmatprep.mubr.msk.f32.mxu0 %vm1572_vm5, %v1571_v11  ;;  %1531 = vmatpush3.bf16.msra.mxu0 %v1530_v30  ;;  %v1242_v11 = vld [vmem:[%s1931_s2 + $0x3] ss:$0 sm:$0xff] }
 0xb6d   :  { %1532 = vmatprep.subr.bf16.mxu0 %v1570_v3  ;;  %v1250_v3 = vld [vmem:[%s1933_s4 + $0x3] ss:$0 sm:$0xff]  ;;  %s1544_s4 = scalar_lea.vmem %s1176_s0, 128 }
 0xb6e   :  { %p1545_p0 = scmp.ne.s32.totalorder %s1176_s0, %s1544_s4  ;;  %p1550_p2 = scmp.lt.s32.totalorder %s1544_s4, %s1544_s4 }
 0xb70   :  { %1534 = vmatpush3.bf16.msra.mxu0 %v1533_v37  ;;  %p1551_p3 = por %p1550_p2, %p1549_p1 }
 0xb72   :  { %p1552_p4 = pnand %p1551_p3, %p1545_p0 }
 0xc3e   :  { %v988_v31 = vpop.f32.mrb[8].mxu0 }
 0xc3f   :  { %v989_v32 = vadd.f32 %v1242_v11, %v988_v31  ;;  %v1440_v33 = vpop.f32.mrb[9].mxu0 }
 0xc41   :  { %v992_v34 = vmax.f32 %v989_v32, 0.0 }
 0xc43   :  { %1450 = vmatmul.mubr.msk.f32.vlgmr.msra.gmra.mrb[10].mxu1 %vm32_vm0, %v992_v34 }
 0xd16   :  { %v1075_v38 = vpop.f32.mrb[10].mxu1 }
 0xd17   :  { %v1076_v39 = vadd.f32 %v1250_v3, %v1075_v38  ;;  %v1451_v40 = vpop.f32.mrb[11].mxu1 }
 0xd19   :  { %v1079_v41 = vmax.f32 %v1076_v39, 0.0 }
 0xd1b   :  { %1461 = vmatmul.mubr.msk.f32.vlgmr.msra.gmra.mrb[10].mxu0 %vm32_vm0, %v1079_v41 }
 0xdee   :  { %v1162_v43 = vpop.f32.mrb[10].mxu0 }
 0xdef   :  { %v1163_v44 = vadd.f32 %v1257_v42, %v1162_v43  ;;  %v1462_v45 = vpop.f32.mrb[11].mxu0 }
 0xdf1   :  { %v1166_v46 = vadd.f32 %v1163_v44, %v1849_v5 }
 0xdf3   :  { %1168 = vst.msk [vmem:[#allocation3] sm:$0xff] %vm1167_vm7, %v1166_v46 }
 0xdf4   :  { %1555 = shalt.err (!%p1552_p4)
}
 0xdf5   :  { %s1556_s6 = scalar_lea.hbm %s1936_s7, 128 }
 0xdf6   :  { %p1557_p5 = scmp.ne.s32.totalorder %s1936_s7, %s1556_s6  ;;  %p1560_p6 = scmp.lt.u32.totalorder %s1556_s6, %s1936_s7 }
 0xdf8   :  { %p1562_p7 = pnand %p1560_p6, %p1557_p5 }
 0xdfa   :  { %1565 = shalt.err (!%p1562_p7)
}
 0xdfb   :  { %1178 = dma.vmem_to_hbm [thread:$0]  %s1176_s0, 128, %s1936_s7, [#allocation4]  }
 0xdfc   :  { %1566 = dma.done.wait [#allocation4], 128  }
 0xdfd   :  { %1567 = vsyncadd [#allocation4], 4294967168 }
 0xdfe   :  { %1182 = vsyncpa [#allocation4], 1 }

</bundles_post_ra>
